<compile_context>
chip_gen: v6e
topology: v6e:2x2x1
jax: 0.10.0
libtpu: 0.0.40
codegen_flags: <defaults>
</compile_context>

<pallas_src>
import jax
import jax.numpy as jnp
from jax.experimental import pallas as pl
from jax.experimental.pallas import tpu as pltpu


# ---------------------------------------------------------------------------
# Synthetic "CompoundKit" vocab sizes (the real ones come from RDKit tables).
# ---------------------------------------------------------------------------
ATOM_NAMES = ["atomic_num", "degree", "chiral_tag", "hybridization"]
ATOM_FEATURE_SIZES = {
    "atomic_num": 16,
    "degree": 11,
    "chiral_tag": 4,
    "hybridization": 8,
}
EMBED_DIM = 32          # embed_dim
N_NODES = 64            # number of atoms (rows)

SUBLANE = 8
LANE = 128
MAX_TILE_N = 1024       # per review: amortize grid-step overhead; VMEM is a non-issue


def _round_up(x, m):
    return ((x + m - 1) // m) * m


def _choose_tile_n(n):
    """Pick the node-tile size (multiple of 8).  Big tiles amortize per-step
    overhead; for mid-size N keep >= 2 grid steps so v7x's two TCs share work."""
    n8 = _round_up(n, SUBLANE)
    if n8 <= 2 * LANE:                    # tiny problem: one step is best
        return n8
    if n8 <= 2 * MAX_TILE_N:              # split into two parallel steps
        return _round_up((n8 + 1) // 2, SUBLANE)
    return MAX_TILE_N


# ---------------------------------------------------------------------------
# Pallas kernel: OR-fused multi-hot x concatenated-table matmul, direct (N, D)
# ---------------------------------------------------------------------------
def atom_embedding_kernel(offsets_ref, idx_ref, wt_ref, out_ref):
    """offsets_ref: SMEM (F,) int32 cumulative vocab offsets (scalar prefetch).
       idx_ref    : (TILE_N, F) int32 raw per-feature indices.
       wt_ref     : (Vpad, D)   f32 fused (concatenated, zero-padded) table.
       out_ref    : (TILE_N, D) f32 sum of the F embeddings."""
    tile_n, num_feat = idx_ref.shape
    vpad, _ = wt_ref.shape

    idx = idx_ref[...]                                              # (TILE_N, F)
    # Lane iota over the padded concatenated vocab axis (regenerated each grid
    # step; a lane iota is essentially free).
    viota = jax.lax.broadcasted_iota(jnp.int32, (tile_n, vpad), 1)  # (TILE_N, Vpad)

    # Multi-hot over the concatenated vocab: F ones per node row.  Feature
    # vocab ranges are disjoint, so boolean OR == sum; one convert at the end.
    # NOTE: like nn.Embedding, indices are assumed in-range; an out-of-range
    # index would silently select from the next feature's vocab block.
    mask = viota == (idx[:, 0:1] + offsets_ref[0])
    for i in range(1, num_feat):             # F is small & static -> unrolled
        mask = jnp.logical_or(mask, viota == (idx[:, i:i + 1] + offsets_ref[i]))
    multihot = mask.astype(jnp.float32)

    # Single MXU pass: (TILE_N, Vpad) @ (Vpad, D).  The feature sum is absorbed
    # by the matmul over the fused vocab axis; padded vocab rows are zero.
    out_ref[...] = jnp.dot(multihot, wt_ref[...],
                           preferred_element_type=jnp.float32)


# ---------------------------------------------------------------------------
# Wrapper
# ---------------------------------------------------------------------------
def atom_embedding(node_features, fused_table, offsets):
    """node_features: int [N, F]; fused_table: f32 [Vpad, D];
       offsets: int32 [F] cumulative vocab offsets.  ->  f32 [N, D]."""
    n, f = node_features.shape
    vpad, d = fused_table.shape

    tile_n = _choose_tile_n(n)
    n_pad = _round_up(n, tile_n)

    idx = node_features.astype(jnp.int32)
    if n_pad != n:
        # Pad with an out-of-range sentinel -> all-zero multi-hot row (sliced off).
        idx = jnp.pad(idx, ((0, n_pad - n), (0, 0)), constant_values=vpad)

    grid = (n_pad // tile_n,)
    out = pl.pallas_call(
        atom_embedding_kernel,
        out_shape=jax.ShapeDtypeStruct((n_pad, d), jnp.float32),
        grid_spec=pltpu.PrefetchScalarGridSpec(
            num_scalar_prefetch=1,                                   # offsets -> SMEM
            grid=grid,
            in_specs=[
                pl.BlockSpec((tile_n, f), lambda t, offs: (t, 0)),   # index tile
                pl.BlockSpec((vpad, d), lambda t, offs: (0, 0)),     # resident table
            ],
            out_specs=pl.BlockSpec((tile_n, d), lambda t, offs: (t, 0)),
        ),
        compiler_params=pltpu.CompilerParams(
            dimension_semantics=("parallel",)),
    )(offsets, idx, fused_table)

    return out[:n] if n_pad != n else out


# ---------------------------------------------------------------------------
# Parameter construction (deterministic, mimics nn.Embedding init ~ N(0,1))
# ---------------------------------------------------------------------------
def build_fused_table(key):
    vocab_sizes = [ATOM_FEATURE_SIZES[name] + 5 for name in ATOM_NAMES]
    offsets, acc = [], 0
    per_tables = []
    for i, v in enumerate(vocab_sizes):
        offsets.append(acc)
        acc += v
        k = jax.random.fold_in(key, i)
        per_tables.append(jax.random.normal(k, (v, EMBED_DIM), dtype=jnp.float32))
    fused = jnp.concatenate(per_tables, axis=0)        # (Vtot, D)
    vtot = fused.shape[0]
    vpad = _round_up(vtot, SUBLANE)                    # 59 -> 64 (not 128)
    fused = jnp.pad(fused, ((0, vpad - vtot), (0, 0))) # zero-pad unused vocab rows
    return fused, per_tables, jnp.array(offsets, jnp.int32), vocab_sizes


# ---------------------------------------------------------------------------
# Pure-JAX reference (matches the PyTorch forward)
# ---------------------------------------------------------------------------
def atom_embedding_ref(node_features, per_feature_tables):
    out = 0
    for i, w in enumerate(per_feature_tables):
        out = out + jnp.take(w, node_features[:, i], axis=0)
    return out


if __name__ == "__main__":
    key = jax.random.PRNGKey(0)
    fused_table, per_tables, offsets, vocab_sizes = build_fused_table(key)

    # node_features: one int column per atom feature name.
    idx_cols = []
    for i, v in enumerate(vocab_sizes):
        k = jax.random.fold_in(key, 1000 + i)
        idx_cols.append(jax.random.randint(k, (N_NODES,), 0, v, dtype=jnp.int32))
    node_features = jnp.stack(idx_cols, axis=1)        # [N, F] int32

    out = atom_embedding(node_features, fused_table, offsets)
    out = jax.block_until_ready(out)

    ref = atom_embedding_ref(node_features, per_tables)
    assert out.shape == (N_NODES, EMBED_DIM)
    assert jnp.allclose(out, ref, atol=1e-5, rtol=1e-5)

    print("KERNEL_OK")
</pallas_src>

<mosaic_0001>
module attributes {stable_mosaic.version = 11 : i64} {
  func.func @atom_embedding_kernel(%arg0: i32, %arg1: memref<4xi32, #tpu.memory_space<smem>>, %arg2: memref<64x4xi32, #tpu.memory_space<vmem>>, %arg3: memref<64x32xf32, #tpu.memory_space<vmem>>, %arg4: memref<64x32xf32, #tpu.memory_space<vmem>>) attributes {dimension_semantics = [#tpu.dimension_semantics<parallel>], iteration_bounds = array<i64: 1>, scalar_prefetch = 1 : i64, scratch_operands = 0 : i64, tpu.core_type = #tpu.core_type<tc>, window_params = [{transform_indices = @transform_0, window_bounds = array<i64: 64, 4>}, {pipeline_mode = #tpu.pipeline_mode<synchronous>, transform_indices = @transform_1, window_bounds = array<i64: 64, 32>}, {transform_indices = @transform_2, window_bounds = array<i64: 64, 32>}]} {
    %c0 = arith.constant 0 : index
    %c0_0 = arith.constant 0 : index
    %0 = vector.load %arg2[%c0, %c0_0] : memref<64x4xi32, #tpu.memory_space<vmem>>, vector<64x4xi32>
    %1 = tpu.iota {dimensions = array<i32: 1>} : vector<64x64xi32>
    %2 = vector.extract_strided_slice %0 {offsets = [0, 0], sizes = [64, 1], strides = [1, 1]} : vector<64x4xi32> to vector<64x1xi32>
    %c0_1 = arith.constant 0 : index
    %3 = memref.load %arg1[%c0_1] : memref<4xi32, #tpu.memory_space<smem>>
    %4 = vector.broadcast %3 : i32 to vector<64x1xi32>
    %5 = arith.addi %2, %4 : vector<64x1xi32>
    %6 = vector.broadcast %5 : vector<64x1xi32> to vector<64x64xi32>
    %7 = arith.cmpi eq, %1, %6 : vector<64x64xi32>
    %8 = vector.extract_strided_slice %0 {offsets = [0, 1], sizes = [64, 1], strides = [1, 1]} : vector<64x4xi32> to vector<64x1xi32>
    %c1 = arith.constant 1 : index
    %9 = memref.load %arg1[%c1] : memref<4xi32, #tpu.memory_space<smem>>
    %10 = vector.broadcast %9 : i32 to vector<64x1xi32>
    %11 = arith.addi %8, %10 : vector<64x1xi32>
    %12 = vector.broadcast %11 : vector<64x1xi32> to vector<64x64xi32>
    %13 = arith.cmpi eq, %1, %12 : vector<64x64xi32>
    %14 = arith.ori %7, %13 : vector<64x64xi1>
    %15 = vector.extract_strided_slice %0 {offsets = [0, 2], sizes = [64, 1], strides = [1, 1]} : vector<64x4xi32> to vector<64x1xi32>
    %c2 = arith.constant 2 : index
    %16 = memref.load %arg1[%c2] : memref<4xi32, #tpu.memory_space<smem>>
    %17 = vector.broadcast %16 : i32 to vector<64x1xi32>
    %18 = arith.addi %15, %17 : vector<64x1xi32>
    %19 = vector.broadcast %18 : vector<64x1xi32> to vector<64x64xi32>
    %20 = arith.cmpi eq, %1, %19 : vector<64x64xi32>
    %21 = arith.ori %14, %20 : vector<64x64xi1>
    %22 = vector.extract_strided_slice %0 {offsets = [0, 3], sizes = [64, 1], strides = [1, 1]} : vector<64x4xi32> to vector<64x1xi32>
    %c3 = arith.constant 3 : index
    %23 = memref.load %arg1[%c3] : memref<4xi32, #tpu.memory_space<smem>>
    %24 = vector.broadcast %23 : i32 to vector<64x1xi32>
    %25 = arith.addi %22, %24 : vector<64x1xi32>
    %26 = vector.broadcast %25 : vector<64x1xi32> to vector<64x64xi32>
    %27 = arith.cmpi eq, %1, %26 : vector<64x64xi32>
    %28 = arith.ori %21, %27 : vector<64x64xi1>
    %29 = arith.extui %28 : vector<64x64xi1> to vector<64x64xi32>
    %30 = arith.sitofp %29 : vector<64x64xi32> to vector<64x64xf32>
    %c0_2 = arith.constant 0 : index
    %c0_3 = arith.constant 0 : index
    %31 = vector.load %arg3[%c0_2, %c0_3] : memref<64x32xf32, #tpu.memory_space<vmem>>, vector<64x32xf32>
    %cst = arith.constant dense<0.000000e+00> : vector<64x32xf32>
    %32 = tpu.matmul %30, %31, %cst {dimension_numbers = #tpu.dot_dimension_numbers<[1], [0], [0], [1], [0, 0, 1, 1], [], []>} : vector<64x64xf32>, vector<64x32xf32>, vector<64x32xf32> -> vector<64x32xf32>
    %c0_4 = arith.constant 0 : index
    %c0_5 = arith.constant 0 : index
    %33 = vector.load %arg4[%c0_4, %c0_5] : memref<64x32xf32, #tpu.memory_space<vmem>>, vector<64x32xf32>
    tpu.vector_store %arg4[%c0_4, %c0_5], %32 {strides = array<i32>} : memref<64x32xf32, #tpu.memory_space<vmem>>, vector<64x32xf32>,
    return
  }
  func.func @transform_0(%arg0: i32, %arg1: memref<4xi32, #tpu.memory_space<smem>>) -> (i32, i32) {
    %c0_i32 = arith.constant 0 : i32
    %c0_i32_0 = arith.constant 0 : i32
    return %arg0, %c0_i32 : i32, i32
  }
  func.func @transform_1(%arg0: i32, %arg1: memref<4xi32, #tpu.memory_space<smem>>) -> (i32, i32) {
    %c0_i32 = arith.constant 0 : i32
    %c0_i32_0 = arith.constant 0 : i32
    %c0_i32_1 = arith.constant 0 : i32
    return %c0_i32, %c0_i32_0 : i32, i32
  }
  func.func @transform_2(%arg0: i32, %arg1: memref<4xi32, #tpu.memory_space<smem>>) -> (i32, i32) {
    %c0_i32 = arith.constant 0 : i32
    %c0_i32_0 = arith.constant 0 : i32
    return %arg0, %c0_i32 : i32, i32
  }
}

</mosaic_0001>

<bundles_post_ra>
// kernel: tpu_custom_call.1
= control target key start
LH: loop header
LB: loop body
LE: loop exit
PB: predicated region body
PF: predicated region fallthrough
CT: control target
= control target key end

     0   :  { %s748_s0 = inlined_call_operand.vmem [shape: s32[4], index: 0, kind: input, shape index: {}]   ;;  %s749_s1 = inlined_call_operand.vmem [shape: s32[64,4], index: 1, kind: input, shape index: {}]   ;;  %s750_s2 = inlined_call_operand.vmem [shape: f32[64,32], index: 2, kind: input, shape index: {}]   ;;  %s751_s3 = inlined_call_operand.vmem [shape: f32[64,32], index: 3, kind: output, shape index: {}]  }
   0x1   :  { %s8_s14 = sshll.u32 %s748_s0, 4  ;;  %s9_s14 = int_to_ptr.vmem [resolvable:$true] %s8_s14 }
   0x2   :  { %s487_s15 = scalar_lea.vmem %s9_s14, 16  ;;  %p492_p1 = scmp.lt.s32.totalorder %s9_s14, %s9_s14 }
   0x3   :  { %p488_p0 = scmp.ne.s32.totalorder %s9_s14, %s487_s15  ;;  %p493_p2 = scmp.lt.s32.totalorder %s487_s15, %s487_s15 }
   0x5   :  { %p494_p3 = por %p493_p2, %p492_p1 }
   0x7   :  { %p495_p4 = pnand %p494_p3, %p488_p0 }
   0x9   :  { %498 = shalt.err (!%p495_p4)  }
   0xa   :  { %s501_s16 = smov [#allocation3]  }
   0xb   :  { %11 = dma.vmem_to_smem %s9_s14, 16, %s501_s16, [#allocation2] }
   0xc   :  { %499 = dma.done.wait [#allocation2], 16 }
   0xd   :  { %500 = vsyncadd [#allocation2], 4294967280 }
   0xe   :  { %13 = sfence }
   0xf   :  { %s387_s17 = sld [smem:[#allocation3 + $0x1]]  ;;  %v502_v0 = vmov 1   ;;  %v503_v1 = vmov 0   ;;  %v535_v2 = vld [vmem:[%s749_s1] sm:$0xff]  ;;  %v19_v10 = vld [vmem:[%s749_s1 + $0x8] sm:$0xff]  ;;  %v564_v14 = vld [vmem:[%s749_s1 + $0x30] sm:$0xff] }
  0x10   :  { %473 = vset.pattern.permute.xlu1 %v502_v0  ;;  %472 = vset.pattern.permute.xlu0 %v503_v1  ;;  %s28_s0 = sld [smem:[#allocation3]]  ;;  %v22_v4 = vld [vmem:[%s749_s1 + $0x20] sm:$0xff]  ;;  %v556_v11 = vld [vmem:[%s749_s1 + $0x28] sm:$0xff]  ;;  %v574_v17 = vld [vmem:[%s749_s1 + $0x18] sm:$0xff]  ;;  %v504_v21 = vmov 2   ;;  %v505_v33 = vmov 3  }
  0x11   :  { %s388_s26 = sld [smem:[#allocation3 + $0x2]]  ;;  %v243_v26 = vld [vmem:[%s750_s2 + $0x38] sm:$0xff]  ;;  %v242_v27 = vld [vmem:[%s750_s2 + $0x30] sm:$0xff]  ;;  %v241_v30 = vld [vmem:[%s750_s2 + $0x28] sm:$0xff]  ;;  %vm752_vm6 = vcmask 523264  }
  0x12   :  { %s389_s4 = sld [smem:[#allocation3 + $0x3]]  ;;  %422 = vmatprep.subr.mxu0 %v243_v26  ;;  %450 = vmatprep.subr.mxu1 %v243_v26  ;;  %v240_v32 = vld [vmem:[%s750_s2 + $0x20] sm:$0xff]  ;;  %v239_v35 = vld [vmem:[%s750_s2 + $0x18] sm:$0xff]  ;;  %v20_v37 = vld [vmem:[%s749_s1 + $0x10] sm:$0xff] }
  0x13   :  { %423 = vmatpush3.msra.mxu0 %v243_v26  ;;  %458 = vmatpush3.msra.mxu1 %v243_v26  ;;  %v238_v38 = vld [vmem:[%s750_s2 + $0x10] sm:$0xff]  ;;  %v237_v40 = vld [vmem:[%s750_s2 + $0x8] sm:$0xff]  ;;  %v236_v43 = vld [vmem:[%s750_s2] sm:$0xff] }
  0x14   :  { %424 = vmatprep.subr.mxu0 %v242_v27  ;;  %451 = vmatprep.subr.mxu1 %v242_v27  ;;  %v25_v47 = vld [vmem:[%s749_s1 + $0x38] sm:$0xff] }
  0x15   :  { %v537_v3 = vstv %s387_s17  ;;  %425 = vmatpush3.msra.mxu0 %v242_v27  ;;  %459 = vmatpush3.msra.mxu1 %v242_v27 }
  0x16   :  { %v72_v5 = vadd.s32 %v537_v3, %v535_v2  ;;  %v544_v6 = vstv %s28_s0  ;;  %v76_v8 = vadd.s32 %v537_v3, %v22_v4  ;;  %v77_v16 = vadd.s32 %v537_v3, %v556_v11  ;;  %426 = vmatprep.subr.mxu0 %v241_v30  ;;  %452 = vmatprep.subr.mxu1 %v241_v30 }
  0x17   :  { %v30_v7 = vadd.s32 %v544_v6, %v535_v2  ;;  %v34_v9 = vadd.s32 %v544_v6, %v22_v4  ;;  %v31_v12 = vadd.s32 %v544_v6, %v19_v10  ;;  %v35_v13 = vadd.s32 %v544_v6, %v556_v11  ;;  %427 = vmatpush3.msra.mxu0 %v241_v30 }
  0x18   :  { %81 = vperm.xlu1 %473, %v72_v5   ;;  %v36_v15 = vadd.s32 %v544_v6, %v564_v14  ;;  %v576_v18 = vstv %s388_s26  ;;  %v33_v19 = vadd.s32 %v544_v6, %v574_v17  ;;  %v73_v22 = vadd.s32 %v537_v3, %v19_v10  ;;  %428 = vmatprep.subr.mxu0 %v240_v32 }
  0x19   :  { %39 = vperm.xlu0 %472, %v30_v7   ;;  %v122_v20 = vadd.s32 %v576_v18, %v535_v2  ;;  %v123_v23 = vadd.s32 %v576_v18, %v19_v10  ;;  %v75_v24 = vadd.s32 %v537_v3, %v574_v17  ;;  %v127_v25 = vadd.s32 %v576_v18, %v556_v11 }
  0x1a   :  { %v597_v28 = vstv %s389_s4  ;;  %v126_v29 = vadd.s32 %v576_v18, %v22_v4  ;;  %v128_v34 = vadd.s32 %v576_v18, %v564_v14  ;;  %429 = vmatpush3.msra.mxu0 %v240_v32  ;;  %460 = vmatpush3.msra.mxu1 %v241_v30  ;;  %v32_v41 = vadd.s32 %v544_v6, %v20_v37 }
  0x1b   :  { %v176_v31 = vadd.s32 %v597_v28, %v22_v4  ;;  %v173_v36 = vadd.s32 %v597_v28, %v19_v10  ;;  %430 = vmatprep.subr.mxu0 %v239_v35  ;;  %453 = vmatprep.subr.mxu1 %v240_v32  ;;  %v172_v39 = vadd.s32 %v597_v28, %v535_v2 }
  0x1c   :  { %93 = vperm.xlu1 %473, %v76_v8   ;;  %431 = vmatpush3.msra.mxu0 %v239_v35  ;;  %v177_v42 = vadd.s32 %v597_v28, %v556_v11  ;;  %v74_v44 = vadd.s32 %v537_v3, %v20_v37  ;;  %v174_v45 = vadd.s32 %v597_v28, %v20_v37  ;;  %v506_v11 = vmov 0.0  }
  0x1d   :  { %51 = vperm.xlu0 %472, %v34_v9   ;;  %461 = vmatpush3.msra.mxu1 %v240_v32  ;;  %v78_v46 = vadd.s32 %v537_v3, %v564_v14  ;;  %v179_v48 = vadd.s32 %v597_v28, %v25_v47  ;;  %v37_v49 = vadd.s32 %v544_v6, %v25_v47 }
  0x1e   :  { %432 = vmatprep.subr.mxu0 %v238_v38  ;;  %454 = vmatprep.subr.mxu1 %v239_v35  ;;  %v79_v50 = vadd.s32 %v537_v3, %v25_v47  ;;  %v124_v51 = vadd.s32 %v576_v18, %v20_v37  ;;  %v125_v52 = vadd.s32 %v576_v18, %v574_v17  ;;  %v26_v3 = vlaneseq }
  0x1f   :  { %433 = vmatpush3.msra.mxu0 %v238_v38  ;;  %462 = vmatpush3.msra.mxu1 %v239_v35  ;;  %v129_v53 = vadd.s32 %v576_v18, %v25_v47  ;;  %v178_v54 = vadd.s32 %v597_v28, %v564_v14  ;;  %v175_v55 = vadd.s32 %v597_v28, %v574_v17 }
  0x20   :  { %474 = vset.pattern.permute.xlu1 %v503_v1  ;;  %434 = vmatprep.subr.mxu0 %v237_v40  ;;  %v663_v6 = vand.u32 127, %v26_v3 }
  0x21   :  { %42 = vperm.xlu0 %472, %v31_v12   ;;  %54 = vperm.xlu1 %474, %v35_v13  }
  0x22   :  { %455 = vmatprep.subr.mxu1 %v238_v38  ;;  %435 = vmatpush3.msra.mxu0 %v237_v40 }
  0x23   :  { %463 = vmatpush3.msra.mxu1 %v238_v38  ;;  %436 = vmatprep.subr.mxu0 %v236_v43 }
  0x24   :  { %456 = vmatprep.subr.mxu1 %v237_v40  ;;  %437 = vmatpush3.msra.mxu0 %v236_v43 }
  0x25   :  { %57 = vperm.xlu0 %472, %v36_v15   ;;  %475 = vset.pattern.permute.xlu1 %v502_v0 }
  0x26   :  { %96 = vperm.xlu1 %475, %v77_v16   ;;  %464 = vmatpush3.msra.mxu1 %v237_v40 }
  0x27   :  { %457 = vmatprep.subr.mxu1 %v236_v43 }
  0x28   :  { %465 = vmatpush3.msra.mxu1 %v236_v43 }
  0x29   :  { %48 = vperm.xlu0 %472, %v33_v19  }
  0x2a   :  { %476 = vset.pattern.permute.xlu1 %v504_v21 }
  0x2b   :  { %131 = vperm.xlu1 %476, %v122_v20  }
  0x2d   :  { %480 = vset.pattern.permute.xlu0 %v502_v0 }
  0x2e   :  { %84 = vperm.xlu0 %480, %v73_v22  }
  0x2f   :  { %134 = vperm.xlu1 %476, %v123_v23  }
  0x32   :  { %90 = vperm.xlu0 %480, %v75_v24  }
  0x33   :  { %146 = vperm.xlu1 %476, %v127_v25  }
  0x36   :  { %482 = vset.pattern.permute.xlu0 %v504_v21 }
  0x37   :  { %143 = vperm.xlu0 %482, %v126_v29   ;;  %477 = vset.pattern.permute.xlu1 %v505_v33 }
  0x38   :  { %193 = vperm.xlu1 %477, %v176_v31  }
  0x3b   :  { %149 = vperm.xlu0 %482, %v128_v34  }
  0x3c   :  { %184 = vperm.xlu1 %477, %v173_v36  }
  0x3f   :  { %485 = vset.pattern.permute.xlu0 %v505_v33 }
  0x40   :  { %181 = vperm.xlu0 %485, %v172_v39   ;;  %478 = vset.pattern.permute.xlu1 %v503_v1 }
  0x41   :  { %45 = vperm.xlu1 %478, %v32_v41  }
  0x44   :  { %196 = vperm.xlu0 %485, %v177_v42  }
  0x45   :  { %479 = vset.pattern.permute.xlu1 %v502_v0 }
  0x46   :  { %87 = vperm.xlu1 %479, %v74_v44  }
  0x48   :  { %187 = vperm.xlu0 %485, %v174_v45  }
  0x4a   :  { %99 = vperm.xlu1 %479, %v78_v46  }
  0x4c   :  { %202 = vperm.xlu0 %485, %v179_v48  }
  0x4e   :  { %481 = vset.pattern.permute.xlu1 %v503_v1 }
  0x4f   :  { %60 = vperm.xlu1 %481, %v37_v49  }
  0x53   :  { %483 = vset.pattern.permute.xlu1 %v502_v0 }
  0x54   :  { %102 = vperm.xlu1 %483, %v79_v50  }
  0x58   :  { %484 = vset.pattern.permute.xlu1 %v504_v21 }
  0x59   :  { %137 = vperm.xlu1 %484, %v124_v51  }
  0x5d   :  { %140 = vperm.xlu1 %484, %v125_v52  }
  0x61   :  { %152 = vperm.xlu1 %484, %v129_v53  }
  0x65   :  { %486 = vset.pattern.permute.xlu1 %v505_v33 }
  0x66   :  { %199 = vperm.xlu1 %486, %v178_v54  }
  0x6a   :  { %190 = vperm.xlu1 %486, %v175_v55  }
  0x93   :  { %v82_v56 = vpop.permute.xlu1 %81 }
  0x94   :  { %v40_v57 = vpop.permute.xlu0 %39  ;;  %vm104_vm10 = vcmp.eq.s32.totalorder %v663_v6, %v82_v56 }
  0x95   :  { %vm62_vm11 = vcmp.eq.s32.totalorder %v663_v6, %v40_v57 }
  0x96   :  { %vm112_vm15 = vmor %vm62_vm11, %vm104_vm10  ;;  %vm753_vm10 = vcmask 523264  }
  0x97   :  { %v94_v58 = vpop.permute.xlu1 %93 }
  0x98   :  { %v52_v59 = vpop.permute.xlu0 %51  ;;  %vm108_vm0 = vcmp.eq.s32.totalorder %v663_v6, %v94_v58 }
  0x99   :  { %vm66_vm1 = vcmp.eq.s32.totalorder %v663_v6, %v52_v59 }
  0x9a   :  { %vm116_vm2 = vmor %vm66_vm1, %vm108_vm0 }
  0x9c   :  { %v55_v60 = vpop.permute.xlu1 %54  ;;  %v43_v61 = vpop.permute.xlu0 %42 }
  0x9d   :  { %vm63_vm7 = vcmp.eq.s32.totalorder %v663_v6, %v43_v61 }
  0xa0   :  { %v657_v62 = vpop.permute.xlu0 %57 }
  0xa1   :  { %v97_v63 = vpop.permute.xlu1 %96 }
  0xa4   :  { %v659_v0 = vpop.permute.xlu0 %48 }
  0xa6   :  { %v132_v1 = vpop.permute.xlu1 %131 }
  0xa7   :  { %vm154_vm12 = vcmp.eq.s32.totalorder %v663_v6, %v132_v1 }
  0xa8   :  { %vm162_vm1 = vmor %vm112_vm15, %vm154_vm12 }
  0xa9   :  { %v85_v2 = vpop.permute.xlu0 %84  ;;  %vm755_vm15 = vmmov %vm753_vm10 }
  0xaa   :  { %v135_v4 = vpop.permute.xlu1 %134  ;;  %vm105_vm8 = vcmp.eq.s32.totalorder %v663_v6, %v85_v2 }
  0xab   :  { %vm113_vm13 = vmor %vm63_vm7, %vm105_vm8  ;;  %vm155_vm14 = vcmp.eq.s32.totalorder %v663_v6, %v135_v4  ;;  %vm67_vm7 = vcmp.eq.s32.totalorder %v663_v6, %v55_v60 }
  0xad   :  { %v661_v5 = vpop.permute.xlu0 %90 }
  0xae   :  { %v147_v7 = vpop.permute.xlu1 %146 }
  0xb2   :  { %v144_v8 = vpop.permute.xlu0 %143 }
  0xb3   :  { %vm158_vm3 = vcmp.eq.s32.totalorder %v663_v6, %v144_v8  ;;  %v194_v9 = vpop.permute.xlu1 %193 }
  0xb4   :  { %vm166_vm4 = vmor %vm116_vm2, %vm158_vm3  ;;  %vm208_vm5 = vcmp.eq.s32.totalorder %v663_v6, %v194_v9  ;;  %vm109_vm3 = vcmp.eq.s32.totalorder %v663_v6, %v97_v63 }
  0xb5   :  { %vm216_vm9 = vmor %vm166_vm4, %vm208_vm5 }
  0xb6   :  { %v150_v10 = vpop.permute.xlu0 %149  ;;  %v394_v12 = vsel %vm216_vm9, 1.0, %v506_v11  ;;  %vm163_vm2 = vmor %vm113_vm13, %vm155_vm14  ;;  %vm159_vm9 = vcmp.eq.s32.totalorder %v663_v6, %v147_v7 }
  0xb7   :  { %v185_v13 = vpop.permute.xlu1 %184  ;;  %444 = vmatprep.mubr.msk.f32.mxu1 %vm752_vm6, %v394_v12  ;;  %vm117_vm8 = vmor %vm67_vm7, %vm109_vm3 }
  0xb8   :  { %vm205_vm0 = vcmp.eq.s32.totalorder %v663_v6, %v185_v13  ;;  %vm167_vm11 = vmor %vm117_vm8, %vm159_vm9 }
  0xb9   :  { %vm213_vm4 = vmor %vm163_vm2, %vm205_vm0 }
  0xba   :  { %v391_v17 = vsel %vm213_vm4, 1.0, %v506_v11  ;;  %vm754_vm13 = vmmov %vm753_vm10 }
  0xbb   :  { %v182_v14 = vpop.permute.xlu0 %181  ;;  %vm756_vm9 = vmmov %vm753_vm10 }
  0xbc   :  { %vm204_vm5 = vcmp.eq.s32.totalorder %v663_v6, %v182_v14  ;;  %v46_v15 = vpop.permute.xlu1 %45 }
  0xbd   :  { %vm212_vm6 = vmor %vm162_vm1, %vm204_vm5  ;;  %vm64_vm0 = vcmp.eq.s32.totalorder %v663_v6, %v46_v15 }
  0xbe   :  { %v390_v16 = vsel %vm212_vm6, 1.0, %v506_v11 }
  0xbf   :  { %438 = vmatprep.mubr.msk.f32.mxu0 %vm753_vm10, %v390_v16  ;;  %v197_v18 = vpop.permute.xlu0 %196  ;;  %vm68_vm10 = vcmp.eq.s32.totalorder %v663_v6, %v657_v62 }
  0xc0   :  { %vm209_vm12 = vcmp.eq.s32.totalorder %v663_v6, %v197_v18  ;;  %439 = vmatmul.mubr.msk.f32.vlgmr.msra.gmra.mxu0 %vm754_vm13, %v391_v17 }
  0xc1   :  { %vm217_vm14 = vmor %vm167_vm11, %vm209_vm12  ;;  %v88_v19 = vpop.permute.xlu1 %87 }
  0xc2   :  { %v395_v20 = vsel %vm217_vm14, 1.0, %v506_v11  ;;  %vm106_vm6 = vcmp.eq.s32.totalorder %v663_v6, %v88_v19  ;;  %vm160_vm14 = vcmp.eq.s32.totalorder %v663_v6, %v150_v10 }
  0xc3   :  { %445 = vmatmul.mubr.msk.f32.vlgmr.msra.gmra.mxu1 %vm755_vm15, %v395_v20  ;;  %v188_v24 = vpop.permute.xlu0 %187  ;;  %vm114_vm2 = vmor %vm64_vm0, %vm106_vm6 }
  0xc4   :  { %vm206_vm1 = vcmp.eq.s32.totalorder %v663_v6, %v188_v24 }
  0xc5   :  { %v100_v21 = vpop.permute.xlu1 %99 }
  0xc6   :  { %vm110_vm7 = vcmp.eq.s32.totalorder %v663_v6, %v100_v21 }
  0xc7   :  { %vm118_vm11 = vmor %vm68_vm10, %vm110_vm7  ;;  %v203_v29 = vpop.permute.xlu0 %202  ;;  %vm757_vm10 = vcmask 523264  }
  0xc8   :  { %vm211_vm0 = vcmp.eq.s32.totalorder %v663_v6, %v203_v29 }
  0xca   :  { %v61_v22 = vpop.permute.xlu1 %60 }
  0xcb   :  { %vm69_vm12 = vcmp.eq.s32.totalorder %v663_v6, %v61_v22 }
  0xcf   :  { %v103_v23 = vpop.permute.xlu1 %102 }
  0xd0   :  { %vm111_vm8 = vcmp.eq.s32.totalorder %v663_v6, %v103_v23 }
  0xd1   :  { %vm119_vm15 = vmor %vm69_vm12, %vm111_vm8 }
  0xd4   :  { %v138_v25 = vpop.permute.xlu1 %137 }
  0xd5   :  { %vm156_vm3 = vcmp.eq.s32.totalorder %v663_v6, %v138_v25 }
  0xd6   :  { %vm164_vm4 = vmor %vm114_vm2, %vm156_vm3  ;;  %vm65_vm2 = vcmp.eq.s32.totalorder %v663_v6, %v659_v0  ;;  %vm107_vm3 = vcmp.eq.s32.totalorder %v663_v6, %v661_v5 }
  0xd7   :  { %vm214_vm5 = vmor %vm164_vm4, %vm206_vm1 }
  0xd8   :  { %v392_v26 = vsel %vm214_vm5, 1.0, %v506_v11  ;;  %v141_v27 = vpop.permute.xlu1 %140  ;;  %vm168_vm1 = vmor %vm118_vm11, %vm160_vm14 }
  0xd9   :  { %441 = vmatprep.mubr.msk.f32.mxu0 %vm756_vm9, %v392_v26  ;;  %vm157_vm9 = vcmp.eq.s32.totalorder %v663_v6, %v141_v27  ;;  %vm115_vm8 = vmor %vm65_vm2, %vm107_vm3 }
  0xda   :  { %vm165_vm11 = vmor %vm115_vm8, %vm157_vm9 }
  0xdc   :  { %v153_v28 = vpop.permute.xlu1 %152 }
  0xdd   :  { %vm161_vm13 = vcmp.eq.s32.totalorder %v663_v6, %v153_v28 }
  0xde   :  { %vm169_vm6 = vmor %vm119_vm15, %vm161_vm13 }
  0xdf   :  { %vm219_vm4 = vmor %vm169_vm6, %vm211_vm0  ;;  %vm374_vm6 = vcmask 261120  }
  0xe0   :  { %v397_v33 = vsel %vm219_vm4, 1.0, %v506_v11  ;;  %vm758_vm13 = vmmov %vm757_vm10 }
  0xe1   :  { %v200_v30 = vpop.permute.xlu1 %199  ;;  %vm759_vm15 = vmmov %vm757_vm10 }
  0xe2   :  { %vm210_vm5 = vcmp.eq.s32.totalorder %v663_v6, %v200_v30 }
  0xe3   :  { %vm218_vm7 = vmor %vm168_vm1, %vm210_vm5 }
  0xe4   :  { %v396_v31 = vsel %vm218_vm7, 1.0, %v506_v11 }
  0xe5   :  { %v191_v32 = vpop.permute.xlu1 %190  ;;  %447 = vmatprep.mubr.msk.f32.mxu1 %vm757_vm10, %v396_v31 }
  0xe6   :  { %vm207_vm12 = vcmp.eq.s32.totalorder %v663_v6, %v191_v32  ;;  %448 = vmatmul.mubr.msk.f32.gmra.mxu1 %vm758_vm13, %v397_v33 }
  0xe7   :  { %vm215_vm14 = vmor %vm165_vm11, %vm207_vm12 }
  0xe8   :  { %v393_v34 = vsel %vm215_vm14, 1.0, %v506_v11 }
  0xe9   :  { %442 = vmatmul.mubr.msk.f32.gmra.mxu0 %vm759_vm15, %v393_v34 }
 0x180   :  { %v440_v35 = vpop.f32.mrf.mxu0 }
 0x181   :  { %376 = vst.msk [vmem:[%s751_s3 + $0x8] sm:$0xff] %vm374_vm6, %v440_v35 }
 0x182   :  { %v335_v36 = vpop.f32.mrf.mxu0 }
 0x183   :  { %375 = vst.msk [vmem:[%s751_s3] sm:$0xff] %vm374_vm6, %v335_v36  ;;  %v446_v37 = vpop.f32.mrf.mxu1 }
 0x184   :  { %380 = vst.msk [vmem:[%s751_s3 + $0x28] sm:$0xff] %vm374_vm6, %v446_v37 }
 0x185   :  { %v355_v38 = vpop.f32.mrf.mxu1 }
 0x186   :  { %379 = vst.msk [vmem:[%s751_s3 + $0x20] sm:$0xff] %vm374_vm6, %v355_v38 }
 0x1a6   :  { %v449_v39 = vpop.f32.mrf.mxu1 }
 0x1a7   :  { %382 = vst.msk [vmem:[%s751_s3 + $0x38] sm:$0xff] %vm374_vm6, %v449_v39 }
 0x1a8   :  { %v365_v40 = vpop.f32.mrf.mxu1 }
 0x1a9   :  { %381 = vst.msk [vmem:[%s751_s3 + $0x30] sm:$0xff] %vm374_vm6, %v365_v40  ;;  %v443_v41 = vpop.f32.mrf.mxu0 }
 0x1aa   :  { %378 = vst.msk [vmem:[%s751_s3 + $0x18] sm:$0xff] %vm374_vm6, %v443_v41 }
 0x1ab   :  { %v345_v42 = vpop.f32.mrf.mxu0 }
 0x1ac   :  { %377 = vst.msk [vmem:[%s751_s3 + $0x10] sm:$0xff] %vm374_vm6, %v345_v42 }

</bundles_post_ra>
